<compile_context>
chip_gen: v7x
topology: tpu7x:2x2x1
jax: 0.10.0
libtpu: 0.0.40
codegen_flags: <defaults>
</compile_context>

<pallas_src>
import functools

import jax
import jax.numpy as jnp
from jax.experimental import pallas as pl
from jax.experimental.pallas import tpu as pltpu

NEG_SLOPE = 0.01  # nn.LeakyReLU default negative_slope


# ----------------------------------------------------------------------------
# Pallas kernel: fused 3x3 / stride-2 conv + bias + LeakyReLU for one row tile
# ----------------------------------------------------------------------------
def _conv3x3_s2_kernel(ph_ref, w_ref, b_ref, o_ref, *, th, wo, cin, cout):
    """One (th x Wo) tile of output rows for one batch element.

    ph_ref : (4, Ho+1, Wo+1, Cin)  stride-2 phase planes of the padded input,
             phase index = 2*(row parity) + (col parity).  VMEM resident.
    w_ref  : (9, Cin, Cout)        tap-major weights (index = kh*3 + kw).
    b_ref  : (1, Cout)
    o_ref  : (th, Wo, Cout)
    """
    i = pl.program_id(1)
    r0 = pl.multiple_of(i * th, th)

    acc = jnp.zeros((th * wo, cout), jnp.float32)
    # Tap (kh, kw) lives in phase (kh % 2, kw % 2) at offset (kh // 2, kw // 2),
    # so every load below is a contiguous (th, wo, cin) window -- no strides,
    # no im2col.  9 accumulated MXU dots.
    for kh in range(3):
        for kw in range(3):
            p = (kh % 2) * 2 + (kw % 2)
            patch = ph_ref[p, pl.ds(r0 + kh // 2, th), pl.ds(kw // 2, wo), :]
            acc += jnp.dot(patch.reshape(th * wo, cin), w_ref[kh * 3 + kw],
                           preferred_element_type=jnp.float32)

    acc = acc + b_ref[...]                                   # bias
    acc = jnp.where(acc >= 0.0, acc, NEG_SLOPE * acc)        # LeakyReLU
    o_ref[...] = acc.reshape(th, wo, cout).astype(o_ref.dtype)


# ----------------------------------------------------------------------------
# Wrapper
# ----------------------------------------------------------------------------
def _pick_row_tile(ho, wo):
    """Largest divisor of Ho with <=~1024 output pixels per tile; prefer one
    that yields >=2 grid blocks so v7x's two TensorCores both get work."""
    cands = [t for t in range(1, ho + 1) if ho % t == 0 and t * wo <= 1024]
    if not cands:
        return 1
    multi = [t for t in cands if ho // t >= 2]
    return max(multi) if multi else max(cands)


def conv_block(x_nchw, w, b):
    """ConvBlock.forward.

    x_nchw : (N, Cin, H, W) float32 (PyTorch NCHW interface)
    w      : (Cout, Cin, 3, 3) torch OIHW layout
    b      : (Cout,)
    returns: (N, Cout, Ho, Wo) with Ho = (H+1)//2, Wo = (W+1)//2
    """
    n, cin, h, wd = x_nchw.shape
    cout = w.shape[0]
    ho, wo = (h + 1) // 2, (wd + 1) // 2

    # NHWC + zero-pad so the padded extent is exactly (2*Ho + 2, 2*Wo + 2):
    # 1 on top/left (padding=1), 1-2 on bottom/right (extra row/col never read).
    x = jnp.transpose(x_nchw, (0, 2, 3, 1))
    xp = jnp.pad(x, ((0, 0),
                     (1, 2 * ho + 1 - h),
                     (1, 2 * wo + 1 - wd),
                     (0, 0)))

    # Stride-2 phase planes: phases[2*dh + dw] = xp[:, dh::2, dw::2, :],
    # each exactly (N, Ho+1, Wo+1, Cin).  ~1x input traffic, replaces im2col.
    phases = jnp.stack([xp[:, dh::2, dw::2, :]
                        for dh in (0, 1) for dw in (0, 1)], axis=0)

    wmat = jnp.transpose(w, (2, 3, 1, 0)).reshape(9, cin, cout)  # (kh*3+kw, Cin, Cout)
    bias = b.reshape(1, cout).astype(jnp.float32)

    th = _pick_row_tile(ho, wo)
    grid = (n, ho // th)

    kernel = functools.partial(_conv3x3_s2_kernel, th=th, wo=wo, cin=cin, cout=cout)
    out_nhwc = pl.pallas_call(
        kernel,
        out_shape=jax.ShapeDtypeStruct((n, ho, wo, cout), jnp.float32),
        grid=grid,
        in_specs=[
            # Per-sample phase tensor: whole thing VMEM-resident; re-DMA'd only
            # when the batch index changes (constant across the row-tile axis).
            pl.BlockSpec((4, None, ho + 1, wo + 1, cin),
                         lambda bi, i: (0, bi, 0, 0, 0)),
            pl.BlockSpec((9, cin, cout), lambda bi, i: (0, 0, 0)),
            pl.BlockSpec((1, cout), lambda bi, i: (0, 0)),
        ],
        out_specs=pl.BlockSpec((None, th, wo, cout), lambda bi, i: (bi, i, 0, 0)),
        compiler_params=pltpu.CompilerParams(
            dimension_semantics=("parallel", "parallel")),
    )(phases, wmat, bias)

    return jnp.transpose(out_nhwc, (0, 3, 1, 2))   # back to NCHW


# ----------------------------------------------------------------------------
# Reference (pure XLA) for a correctness check
# ----------------------------------------------------------------------------
def conv_block_reference(x_nchw, w, b):
    out = jax.lax.conv_general_dilated(
        x_nchw, w, window_strides=(2, 2), padding=((1, 1), (1, 1)),
        dimension_numbers=("NCHW", "OIHW", "NCHW"),
        precision=jax.lax.Precision.HIGHEST)
    out = out + b.reshape(1, -1, 1, 1)
    return jnp.where(out >= 0.0, out, NEG_SLOPE * out)


if __name__ == "__main__":
    key = jax.random.PRNGKey(0)
    kx, kw_, kb = jax.random.split(key, 3)
    # Small shapes consistent with the module; Wo = 8 keeps in-kernel reshapes
    # aligned to the (8, 128) sublane tile.
    N, CIN, COUT, H, W = 2, 32, 64, 16, 16
    x = jax.random.uniform(kx, (N, CIN, H, W), dtype=jnp.float32)
    w = jax.random.normal(kw_, (COUT, CIN, 3, 3), jnp.float32) / jnp.sqrt(CIN * 9.0)
    b = jax.random.normal(kb, (COUT,), jnp.float32) * 0.1

    fwd = jax.jit(conv_block)
    out = fwd(x, w, b)
    jax.block_until_ready(out)
    assert out.shape == (N, COUT, H // 2, W // 2)

    ref = conv_block_reference(x, w, b)
    max_err = float(jnp.max(jnp.abs(out - ref)))
    assert jnp.allclose(out, ref, atol=1e-3, rtol=1e-3), max_err
    print("KERNEL_OK")
</pallas_src>

<mosaic_0001>
module attributes {stable_mosaic.version = 11 : i64} {
  func.func @_conv3x3_s2_kernel(%arg0: i32, %arg1: i32, %arg2: memref<4x1x9x9x32xf32, #tpu.memory_space<vmem>>, %arg3: memref<9x32x64xf32, #tpu.memory_space<vmem>>, %arg4: memref<1x64xf32, #tpu.memory_space<vmem>>, %arg5: memref<1x4x8x64xf32, #tpu.memory_space<vmem>>) attributes {dimension_semantics = [#tpu.dimension_semantics<parallel>, #tpu.dimension_semantics<parallel>], iteration_bounds = array<i64: 2, 2>, scalar_prefetch = 0 : i64, scratch_operands = 0 : i64, tpu.core_type = #tpu.core_type<tc>, window_params = [{transform_indices = @transform_0, window_bounds = array<i64: 4, 1, 9, 9, 32>}, {pipeline_mode = #tpu.pipeline_mode<synchronous>, transform_indices = @transform_1, window_bounds = array<i64: 9, 32, 64>}, {pipeline_mode = #tpu.pipeline_mode<synchronous>, transform_indices = @transform_2, window_bounds = array<i64: 1, 64>}, {transform_indices = @transform_3, window_bounds = array<i64: 1, 4, 8, 64>}]} {
    %c4_i32 = arith.constant 4 : i32
    %0 = arith.muli %arg1, %c4_i32 : i32
    %1 = tpu.assume_multiple %0, 4 : i32
    %cst = arith.constant 0.000000e+00 : f32
    %2 = vector.broadcast %cst : f32 to vector<32x64xf32>
    %c0_i32 = arith.constant 0 : i32
    %3 = arith.addi %1, %c0_i32 : i32
    %c0 = arith.constant 0 : index
    %c0_0 = arith.constant 0 : index
    %4 = arith.index_cast %3 : i32 to index
    %c0_1 = arith.constant 0 : index
    %c0_2 = arith.constant 0 : index
    %5 = vector.load %arg2[%c0, %c0_0, %4, %c0_1, %c0_2] : memref<4x1x9x9x32xf32, #tpu.memory_space<vmem>>, vector<1x1x4x8x32xf32>
    %6 = vector.shape_cast %5 : vector<1x1x4x8x32xf32> to vector<4x8x32xf32>
    %7 = vector.shape_cast %6 : vector<4x8x32xf32> to vector<32x32xf32>
    %c0_3 = arith.constant 0 : index
    %c0_4 = arith.constant 0 : index
    %c0_5 = arith.constant 0 : index
    %8 = vector.load %arg3[%c0_3, %c0_4, %c0_5] : memref<9x32x64xf32, #tpu.memory_space<vmem>>, vector<1x32x64xf32>
    %9 = vector.shape_cast %8 : vector<1x32x64xf32> to vector<32x64xf32>
    %cst_6 = arith.constant dense<0.000000e+00> : vector<32x64xf32>
    %10 = tpu.matmul %7, %9, %cst_6 {dimension_numbers = #tpu.dot_dimension_numbers<[1], [0], [0], [1], [0, 0, 1, 1], [], []>} : vector<32x32xf32>, vector<32x64xf32>, vector<32x64xf32> -> vector<32x64xf32>
    %11 = arith.addf %2, %10 : vector<32x64xf32>
    %c0_i32_7 = arith.constant 0 : i32
    %12 = arith.addi %1, %c0_i32_7 : i32
    %c1 = arith.constant 1 : index
    %c0_8 = arith.constant 0 : index
    %13 = arith.index_cast %12 : i32 to index
    %c0_9 = arith.constant 0 : index
    %c0_10 = arith.constant 0 : index
    %14 = vector.load %arg2[%c1, %c0_8, %13, %c0_9, %c0_10] : memref<4x1x9x9x32xf32, #tpu.memory_space<vmem>>, vector<1x1x4x8x32xf32>
    %15 = vector.shape_cast %14 : vector<1x1x4x8x32xf32> to vector<4x8x32xf32>
    %16 = vector.shape_cast %15 : vector<4x8x32xf32> to vector<32x32xf32>
    %c1_11 = arith.constant 1 : index
    %c0_12 = arith.constant 0 : index
    %c0_13 = arith.constant 0 : index
    %17 = vector.load %arg3[%c1_11, %c0_12, %c0_13] : memref<9x32x64xf32, #tpu.memory_space<vmem>>, vector<1x32x64xf32>
    %18 = vector.shape_cast %17 : vector<1x32x64xf32> to vector<32x64xf32>
    %cst_14 = arith.constant dense<0.000000e+00> : vector<32x64xf32>
    %19 = tpu.matmul %16, %18, %cst_14 {dimension_numbers = #tpu.dot_dimension_numbers<[1], [0], [0], [1], [0, 0, 1, 1], [], []>} : vector<32x32xf32>, vector<32x64xf32>, vector<32x64xf32> -> vector<32x64xf32>
    %20 = arith.addf %11, %19 : vector<32x64xf32>
    %c0_i32_15 = arith.constant 0 : i32
    %21 = arith.addi %1, %c0_i32_15 : i32
    %c0_16 = arith.constant 0 : index
    %c0_17 = arith.constant 0 : index
    %22 = arith.index_cast %21 : i32 to index
    %c1_18 = arith.constant 1 : index
    %c0_19 = arith.constant 0 : index
    %23 = vector.load %arg2[%c0_16, %c0_17, %22, %c1_18, %c0_19] : memref<4x1x9x9x32xf32, #tpu.memory_space<vmem>>, vector<1x1x4x8x32xf32>
    %24 = vector.shape_cast %23 : vector<1x1x4x8x32xf32> to vector<4x8x32xf32>
    %25 = vector.shape_cast %24 : vector<4x8x32xf32> to vector<32x32xf32>
    %c2 = arith.constant 2 : index
    %c0_20 = arith.constant 0 : index
    %c0_21 = arith.constant 0 : index
    %26 = vector.load %arg3[%c2, %c0_20, %c0_21] : memref<9x32x64xf32, #tpu.memory_space<vmem>>, vector<1x32x64xf32>
    %27 = vector.shape_cast %26 : vector<1x32x64xf32> to vector<32x64xf32>
    %cst_22 = arith.constant dense<0.000000e+00> : vector<32x64xf32>
    %28 = tpu.matmul %25, %27, %cst_22 {dimension_numbers = #tpu.dot_dimension_numbers<[1], [0], [0], [1], [0, 0, 1, 1], [], []>} : vector<32x32xf32>, vector<32x64xf32>, vector<32x64xf32> -> vector<32x64xf32>
    %29 = arith.addf %20, %28 : vector<32x64xf32>
    %c0_i32_23 = arith.constant 0 : i32
    %30 = arith.addi %1, %c0_i32_23 : i32
    %c2_24 = arith.constant 2 : index
    %c0_25 = arith.constant 0 : index
    %31 = arith.index_cast %30 : i32 to index
    %c0_26 = arith.constant 0 : index
    %c0_27 = arith.constant 0 : index
    %32 = vector.load %arg2[%c2_24, %c0_25, %31, %c0_26, %c0_27] : memref<4x1x9x9x32xf32, #tpu.memory_space<vmem>>, vector<1x1x4x8x32xf32>
    %33 = vector.shape_cast %32 : vector<1x1x4x8x32xf32> to vector<4x8x32xf32>
    %34 = vector.shape_cast %33 : vector<4x8x32xf32> to vector<32x32xf32>
    %c3 = arith.constant 3 : index
    %c0_28 = arith.constant 0 : index
    %c0_29 = arith.constant 0 : index
    %35 = vector.load %arg3[%c3, %c0_28, %c0_29] : memref<9x32x64xf32, #tpu.memory_space<vmem>>, vector<1x32x64xf32>
    %36 = vector.shape_cast %35 : vector<1x32x64xf32> to vector<32x64xf32>
    %cst_30 = arith.constant dense<0.000000e+00> : vector<32x64xf32>
    %37 = tpu.matmul %34, %36, %cst_30 {dimension_numbers = #tpu.dot_dimension_numbers<[1], [0], [0], [1], [0, 0, 1, 1], [], []>} : vector<32x32xf32>, vector<32x64xf32>, vector<32x64xf32> -> vector<32x64xf32>
    %38 = arith.addf %29, %37 : vector<32x64xf32>
    %c0_i32_31 = arith.constant 0 : i32
    %39 = arith.addi %1, %c0_i32_31 : i32
    %c3_32 = arith.constant 3 : index
    %c0_33 = arith.constant 0 : index
    %40 = arith.index_cast %39 : i32 to index
    %c0_34 = arith.constant 0 : index
    %c0_35 = arith.constant 0 : index
    %41 = vector.load %arg2[%c3_32, %c0_33, %40, %c0_34, %c0_35] : memref<4x1x9x9x32xf32, #tpu.memory_space<vmem>>, vector<1x1x4x8x32xf32>
    %42 = vector.shape_cast %41 : vector<1x1x4x8x32xf32> to vector<4x8x32xf32>
    %43 = vector.shape_cast %42 : vector<4x8x32xf32> to vector<32x32xf32>
    %c4 = arith.constant 4 : index
    %c0_36 = arith.constant 0 : index
    %c0_37 = arith.constant 0 : index
    %44 = vector.load %arg3[%c4, %c0_36, %c0_37] : memref<9x32x64xf32, #tpu.memory_space<vmem>>, vector<1x32x64xf32>
    %45 = vector.shape_cast %44 : vector<1x32x64xf32> to vector<32x64xf32>
    %cst_38 = arith.constant dense<0.000000e+00> : vector<32x64xf32>
    %46 = tpu.matmul %43, %45, %cst_38 {dimension_numbers = #tpu.dot_dimension_numbers<[1], [0], [0], [1], [0, 0, 1, 1], [], []>} : vector<32x32xf32>, vector<32x64xf32>, vector<32x64xf32> -> vector<32x64xf32>
    %47 = arith.addf %38, %46 : vector<32x64xf32>
    %c0_i32_39 = arith.constant 0 : i32
    %48 = arith.addi %1, %c0_i32_39 : i32
    %c2_40 = arith.constant 2 : index
    %c0_41 = arith.constant 0 : index
    %49 = arith.index_cast %48 : i32 to index
    %c1_42 = arith.constant 1 : index
    %c0_43 = arith.constant 0 : index
    %50 = vector.load %arg2[%c2_40, %c0_41, %49, %c1_42, %c0_43] : memref<4x1x9x9x32xf32, #tpu.memory_space<vmem>>, vector<1x1x4x8x32xf32>
    %51 = vector.shape_cast %50 : vector<1x1x4x8x32xf32> to vector<4x8x32xf32>
    %52 = vector.shape_cast %51 : vector<4x8x32xf32> to vector<32x32xf32>
    %c5 = arith.constant 5 : index
    %c0_44 = arith.constant 0 : index
    %c0_45 = arith.constant 0 : index
    %53 = vector.load %arg3[%c5, %c0_44, %c0_45] : memref<9x32x64xf32, #tpu.memory_space<vmem>>, vector<1x32x64xf32>
    %54 = vector.shape_cast %53 : vector<1x32x64xf32> to vector<32x64xf32>
    %cst_46 = arith.constant dense<0.000000e+00> : vector<32x64xf32>
    %55 = tpu.matmul %52, %54, %cst_46 {dimension_numbers = #tpu.dot_dimension_numbers<[1], [0], [0], [1], [0, 0, 1, 1], [], []>} : vector<32x32xf32>, vector<32x64xf32>, vector<32x64xf32> -> vector<32x64xf32>
    %56 = arith.addf %47, %55 : vector<32x64xf32>
    %c1_i32 = arith.constant 1 : i32
    %57 = arith.addi %1, %c1_i32 : i32
    %c0_47 = arith.constant 0 : index
    %c0_48 = arith.constant 0 : index
    %58 = arith.index_cast %57 : i32 to index
    %c0_49 = arith.constant 0 : index
    %c0_50 = arith.constant 0 : index
    %59 = vector.load %arg2[%c0_47, %c0_48, %58, %c0_49, %c0_50] : memref<4x1x9x9x32xf32, #tpu.memory_space<vmem>>, vector<1x1x4x8x32xf32>
    %60 = vector.shape_cast %59 : vector<1x1x4x8x32xf32> to vector<4x8x32xf32>
    %61 = vector.shape_cast %60 : vector<4x8x32xf32> to vector<32x32xf32>
    %c6 = arith.constant 6 : index
    %c0_51 = arith.constant 0 : index
    %c0_52 = arith.constant 0 : index
    %62 = vector.load %arg3[%c6, %c0_51, %c0_52] : memref<9x32x64xf32, #tpu.memory_space<vmem>>, vector<1x32x64xf32>
    %63 = vector.shape_cast %62 : vector<1x32x64xf32> to vector<32x64xf32>
    %cst_53 = arith.constant dense<0.000000e+00> : vector<32x64xf32>
    %64 = tpu.matmul %61, %63, %cst_53 {dimension_numbers = #tpu.dot_dimension_numbers<[1], [0], [0], [1], [0, 0, 1, 1], [], []>} : vector<32x32xf32>, vector<32x64xf32>, vector<32x64xf32> -> vector<32x64xf32>
    %65 = arith.addf %56, %64 : vector<32x64xf32>
    %c1_i32_54 = arith.constant 1 : i32
    %66 = arith.addi %1, %c1_i32_54 : i32
    %c1_55 = arith.constant 1 : index
    %c0_56 = arith.constant 0 : index
    %67 = arith.index_cast %66 : i32 to index
    %c0_57 = arith.constant 0 : index
    %c0_58 = arith.constant 0 : index
    %68 = vector.load %arg2[%c1_55, %c0_56, %67, %c0_57, %c0_58] : memref<4x1x9x9x32xf32, #tpu.memory_space<vmem>>, vector<1x1x4x8x32xf32>
    %69 = vector.shape_cast %68 : vector<1x1x4x8x32xf32> to vector<4x8x32xf32>
    %70 = vector.shape_cast %69 : vector<4x8x32xf32> to vector<32x32xf32>
    %c7 = arith.constant 7 : index
    %c0_59 = arith.constant 0 : index
    %c0_60 = arith.constant 0 : index
    %71 = vector.load %arg3[%c7, %c0_59, %c0_60] : memref<9x32x64xf32, #tpu.memory_space<vmem>>, vector<1x32x64xf32>
    %72 = vector.shape_cast %71 : vector<1x32x64xf32> to vector<32x64xf32>
    %cst_61 = arith.constant dense<0.000000e+00> : vector<32x64xf32>
    %73 = tpu.matmul %70, %72, %cst_61 {dimension_numbers = #tpu.dot_dimension_numbers<[1], [0], [0], [1], [0, 0, 1, 1], [], []>} : vector<32x32xf32>, vector<32x64xf32>, vector<32x64xf32> -> vector<32x64xf32>
    %74 = arith.addf %65, %73 : vector<32x64xf32>
    %c1_i32_62 = arith.constant 1 : i32
    %75 = arith.addi %1, %c1_i32_62 : i32
    %c0_63 = arith.constant 0 : index
    %c0_64 = arith.constant 0 : index
    %76 = arith.index_cast %75 : i32 to index
    %c1_65 = arith.constant 1 : index
    %c0_66 = arith.constant 0 : index
    %77 = vector.load %arg2[%c0_63, %c0_64, %76, %c1_65, %c0_66] : memref<4x1x9x9x32xf32, #tpu.memory_space<vmem>>, vector<1x1x4x8x32xf32>
    %78 = vector.shape_cast %77 : vector<1x1x4x8x32xf32> to vector<4x8x32xf32>
    %79 = vector.shape_cast %78 : vector<4x8x32xf32> to vector<32x32xf32>
    %c8 = arith.constant 8 : index
    %c0_67 = arith.constant 0 : index
    %c0_68 = arith.constant 0 : index
    %80 = vector.load %arg3[%c8, %c0_67, %c0_68] : memref<9x32x64xf32, #tpu.memory_space<vmem>>, vector<1x32x64xf32>
    %81 = vector.shape_cast %80 : vector<1x32x64xf32> to vector<32x64xf32>
    %cst_69 = arith.constant dense<0.000000e+00> : vector<32x64xf32>
    %82 = tpu.matmul %79, %81, %cst_69 {dimension_numbers = #tpu.dot_dimension_numbers<[1], [0], [0], [1], [0, 0, 1, 1], [], []>} : vector<32x32xf32>, vector<32x64xf32>, vector<32x64xf32> -> vector<32x64xf32>
    %83 = arith.addf %74, %82 : vector<32x64xf32>
    %c0_70 = arith.constant 0 : index
    %c0_71 = arith.constant 0 : index
    %84 = vector.load %arg4[%c0_70, %c0_71] : memref<1x64xf32, #tpu.memory_space<vmem>>, vector<1x64xf32>
    %85 = vector.broadcast %84 : vector<1x64xf32> to vector<32x64xf32>
    %86 = arith.addf %83, %85 : vector<32x64xf32>
    %cst_72 = arith.constant 0.000000e+00 : f32
    %87 = vector.broadcast %cst_72 : f32 to vector<32x64xf32>
    %88 = arith.cmpf oge, %86, %87 : vector<32x64xf32>
    %cst_73 = arith.constant 0.00999999977 : f32
    %89 = vector.broadcast %cst_73 : f32 to vector<32x64xf32>
    %90 = arith.mulf %89, %86 : vector<32x64xf32>
    %91 = arith.select %88, %86, %90 : vector<32x64xi1>, vector<32x64xf32>
    %92 = vector.shape_cast %91 : vector<32x64xf32> to vector<4x8x64xf32>
    %c0_74 = arith.constant 0 : index
    %c0_75 = arith.constant 0 : index
    %c0_76 = arith.constant 0 : index
    %c0_77 = arith.constant 0 : index
    %93 = vector.load %arg5[%c0_74, %c0_75, %c0_76, %c0_77] : memref<1x4x8x64xf32, #tpu.memory_space<vmem>>, vector<1x4x8x64xf32>
    %94 = vector.shape_cast %93 : vector<1x4x8x64xf32> to vector<4x8x64xf32>
    %95 = vector.shape_cast %92 : vector<4x8x64xf32> to vector<1x4x8x64xf32>
    tpu.vector_store %arg5[%c0_74, %c0_75, %c0_76, %c0_77], %95 {strides = array<i32>} : memref<1x4x8x64xf32, #tpu.memory_space<vmem>>, vector<1x4x8x64xf32>,
    return
  }
  func.func @transform_0(%arg0: i32, %arg1: i32) -> (i32, i32, i32, i32, i32) {
    %c0_i32 = arith.constant 0 : i32
    %c0_i32_0 = arith.constant 0 : i32
    %c0_i32_1 = arith.constant 0 : i32
    %c0_i32_2 = arith.constant 0 : i32
    %c0_i32_3 = arith.constant 0 : i32
    return %c0_i32, %arg0, %c0_i32_0, %c0_i32_1, %c0_i32_2 : i32, i32, i32, i32, i32
  }
  func.func @transform_1(%arg0: i32, %arg1: i32) -> (i32, i32, i32) {
    %c0_i32 = arith.constant 0 : i32
    %c0_i32_0 = arith.constant 0 : i32
    %c0_i32_1 = arith.constant 0 : i32
    %c0_i32_2 = arith.constant 0 : i32
    return %c0_i32, %c0_i32_0, %c0_i32_1 : i32, i32, i32
  }
  func.func @transform_2(%arg0: i32, %arg1: i32) -> (i32, i32) {
    %c0_i32 = arith.constant 0 : i32
    %c0_i32_0 = arith.constant 0 : i32
    %c0_i32_1 = arith.constant 0 : i32
    return %c0_i32, %c0_i32_0 : i32, i32
  }
  func.func @transform_3(%arg0: i32, %arg1: i32) -> (i32, i32, i32, i32) {
    %c0_i32 = arith.constant 0 : i32
    %c0_i32_0 = arith.constant 0 : i32
    %c0_i32_1 = arith.constant 0 : i32
    return %arg0, %arg1, %c0_i32, %c0_i32_0 : i32, i32, i32, i32
  }
}

</mosaic_0001>

<bundles_post_ra>
// kernel: conv_block.1
= control target key start
LH: loop header
LB: loop body
LE: loop exit
PB: predicated region body
PF: predicated region fallthrough
CT: control target
= control target key end

     0   :  { %s2813_s0 = inlined_call_operand.vmem [shape: f32[4,2,9,9,32], index: 0, kind: input, shape index: {}]   ;;  %s2814_s1 = inlined_call_operand.vmem [shape: f32[9,32,64], index: 1, kind: input, shape index: {}]   ;;  %s2815_s2 = inlined_call_operand.vmem [shape: f32[1,64], index: 2, kind: input, shape index: {}]   ;;  %s2816_s3 = inlined_call_operand.hbm [shape: f32[2,8,8,64], index: 3, kind: output, shape index: {}]  }
   0x1   :  { %2817 = sst [smem:[#allocation6_spill]] %s2813_s0 }
   0x2   :  { %8 = vsyncpa [#allocation4], 0 }
   0x3   :  { %10 = vsyncpa [#allocation4 + $0x1], 0  ;;  %s2299_s12 = smov 0   ;;  %s2301_s13 = smov 0  }
   0x4   :  { %s2303_s14 = smov 0   ;;  %s2305_s15 = smov 0  }
   0x5   :  { %s2307_s16 = smov 0   ;;  %s2309_s17 = smov 0  }
   0x6   :  { %s2311_s18 = smov 0   ;;  %s2313_s19 = smov 0  }
   0x7   :  { %s2315_s20 = smov 0   ;;  %s2317_s21 = smov 0  }
   0x8 LB: > { %s1644_s22 = sadd.s32 4294967295, %s2274_s21   ;;  %s1645_s23 = sadd.s32 4294967294, %s2274_s21   ;;  %s2274_s21 = sphi %s2317_s21, %s16_s21   ;;  %s2270_s20 = sphi %s2315_s20, %s2830_s20   ;;  %s2266_s19 = sphi %s2313_s19, %s2829_s19   ;;  %s2262_s18 = sphi %s2311_s18, %s2828_s18   ;;  %s2258_s17 = sphi %s2309_s17, %s2827_s17   ;;  %s2254_s16 = sphi %s2307_s16, %s2826_s16   ;;  %s2250_s15 = sphi %s2305_s15, %s2825_s15   ;;  %s2246_s14 = sphi %s2303_s14, %s2824_s14   ;;  %s2242_s13 = sphi %s2301_s13, %s2823_s13   ;;  %s2238_s12 = sphi %s2299_s12, %s2822_s12  }
   0x9   : > { %s25_s24 = sadd.s32 1, %s2266_s19  ;;  %s28_s25 = sadd.s32 1, %s2270_s20 }
   0xa   : > { %p26_p0 = scmp.ge.s32.totalorder %s25_s24, 2  ;;  %s35_s26 = sadd.s32 1, %s2254_s16 }
   0xb   : > { %p42_p1 = scmp.ne.s32.totalorder %s2254_s16, %s2250_s15  ;;  %p43_p2 = scmp.eq.s32.totalorder %s2274_s21, 0 }
   0xc   : > { %s2832_s24 = smov (%p26_p0, %s25_s24), 0  ;;  %s2834_s25 = smov (!%p26_p0, %s28_s25), %s2270_s20 }
   0xd   : > { %p2360_p3 = por %p43_p2, %p42_p1  ;;  %s101_s28 = ssub.s32 %s2266_s19, %s2832_s24 }
   0xe   : > { %p30_p4 = scmp.ge.s32.totalorder %s2834_s25, 2  ;;  %s105_s29 = sadd.s32 1, %s2246_s14 }
   0xf   : > { %p115_p5 = scmp.ne.s32.totalorder %s2246_s14, %s2242_s13  ;;  %p116_p6 = scmp.eq.s32.totalorder %s1644_s22, 3 }
  0x10   : > { %s2836_s25 = smov (%p30_p4, %s2834_s25), 0  ;;  %p121_p8 = scmp.ne.s32.totalorder %s2242_s13, %s2238_s12 }
  0x11   : > { %p2371_p7 = por %p116_p6, %p115_p5  ;;  %s32_s4 = ssub.s32 %s2270_s20, %s2836_s25 }
  0x12   : > { %p122_p9 = scmp.eq.s32.totalorder %s1645_s23, 3  ;;  %p33_p10 = scmp.eq.s32.totalorder %s32_s4, 0 }
  0x13   : > { %s102_s5 = sor.u32 %s101_s28, %s32_s4  ;;  %p1647_p13 = scmp.ge.s32.totalorder %s2274_s21, 4 }
  0x14   : > { %p103_p11 = scmp.eq.s32.totalorder %s102_s5, 0  ;;  %p2379_p12 = por %p122_p9, %p121_p8 }
  0x15   : > { %s2384_s7 = scalar_select %p33_p10, %s2254_s16, %s35_s26  }
  0x16   : > { %s2387_s8 = scalar_select %p103_p11, %s2246_s14, %s105_s29  }
  0x17   : > { %144 = sbr.rel (%p1647_p13) target bundleno = 75 (0x4b), region = 24 }
  0x1e   : > { %147 = sbr.rel (!%p2360_p3) target bundleno = 75 (0x4b), region = 28  ;;  %s149_s9 = sand.u32 (%p2360_p3), 1, %s2254_s16  }
  0x1f   : > { %s2073_s10 = smul.u32 (%p2360_p3), 144, %s2270_s20  ;;  %s2821_s0 = sld [smem:[#allocation6_spill]] (%p2360_p3) }
  0x20   : > { %s2072_s11 = smul.u32 (%p2360_p3), 576, %s149_s9 }
  0x22   : > { %s2402_s26 = scalar_lea.vmem (%p2360_p3), [#allocation2], %s2072_s11 }
  0x25   : > { %s2397_s28 = scalar_lea.vmem %s2821_s0, %s2073_s10 }
  0x26   : > { %v324_v0 = vld [vmem:[%s2397_s28] sm:$0xff]  ;;  %v326_v1 = vld [vmem:[%s2397_s28 + $0x8] sm:$0xff]  ;;  %v328_v2 = vld [vmem:[%s2397_s28 + $0x10] sm:$0xff] }
  0x27   : > { %325 = vst [vmem:[%s2402_s26] sm:$0xff] %v324_v0  ;;  %327 = vst [vmem:[%s2402_s26 + $0x8] sm:$0xff] %v326_v1  ;;  %v330_v3 = vld [vmem:[%s2397_s28 + $0x18] sm:$0xff]  ;;  %v332_v4 = vld [vmem:[%s2397_s28 + $0x20] sm:$0xff] }
  0x28   : > { %329 = vst [vmem:[%s2402_s26 + $0x10] sm:$0xff] %v328_v2  ;;  %v334_v5 = vld [vmem:[%s2397_s28 + $0x28] sm:$0xff]  ;;  %331 = vst [vmem:[%s2402_s26 + $0x18] sm:$0xff] %v330_v3  ;;  %v336_v6 = vld [vmem:[%s2397_s28 + $0x30] sm:$0xff] }
  0x29   : > { %333 = vst [vmem:[%s2402_s26 + $0x20] sm:$0xff] %v332_v4  ;;  %335 = vst [vmem:[%s2402_s26 + $0x28] sm:$0xff] %v334_v5  ;;  %v338_v7 = vld [vmem:[%s2397_s28 + $0x38] sm:$0xff]  ;;  %v340_v8 = vld [vmem:[%s2397_s28 + $0x40] sm:$0xff] }
  0x2a   : > { %337 = vst [vmem:[%s2402_s26 + $0x30] sm:$0xff] %v336_v6  ;;  %339 = vst [vmem:[%s2402_s26 + $0x38] sm:$0xff] %v338_v7  ;;  %v342_v9 = vld [vmem:[%s2397_s28 + $0x48] sm:$0xff]  ;;  %v344_v10 = vld [vmem:[%s2397_s28 + $0x50] sm:$0xff] }
  0x2b   : > { %341 = vst [vmem:[%s2402_s26 + $0x40] sm:$0xff] %v340_v8  ;;  %v346_v11 = vld [vmem:[%s2397_s28 + $0x58] sm:$0xff]  ;;  %343 = vst [vmem:[%s2402_s26 + $0x48] sm:$0xff] %v342_v9  ;;  %v348_v12 = vld [vmem:[%s2397_s28 + $0x60] sm:$0xff] }
  0x2c   : > { %345 = vst [vmem:[%s2402_s26 + $0x50] sm:$0xff] %v344_v10  ;;  %347 = vst [vmem:[%s2402_s26 + $0x58] sm:$0xff] %v346_v11  ;;  %v350_v13 = vld [vmem:[%s2397_s28 + $0x68] sm:$0xff]  ;;  %v352_v14 = vld [vmem:[%s2397_s28 + $0x70] sm:$0xff] }
  0x2d   : > { %349 = vst [vmem:[%s2402_s26 + $0x60] sm:$0xff] %v348_v12  ;;  %351 = vst [vmem:[%s2402_s26 + $0x68] sm:$0xff] %v350_v13  ;;  %v354_v15 = vld [vmem:[%s2397_s28 + $0x78] sm:$0xff]  ;;  %v356_v16 = vld [vmem:[%s2397_s28 + $0x80] sm:$0xff] }
  0x2e   : > { %353 = vst [vmem:[%s2402_s26 + $0x70] sm:$0xff] %v352_v14  ;;  %v358_v17 = vld [vmem:[%s2397_s28 + $0x88] sm:$0xff]  ;;  %355 = vst [vmem:[%s2402_s26 + $0x78] sm:$0xff] %v354_v15  ;;  %v360_v18 = vld [vmem:[%s2397_s28 + $0x120] sm:$0xff] }
  0x2f   : > { %357 = vst [vmem:[%s2402_s26 + $0x80] sm:$0xff] %v356_v16  ;;  %359 = vst [vmem:[%s2402_s26 + $0x88] sm:$0xff] %v358_v17  ;;  %v362_v19 = vld [vmem:[%s2397_s28 + $0x128] sm:$0xff]  ;;  %v364_v20 = vld [vmem:[%s2397_s28 + $0x130] sm:$0xff] }
  0x30   : > { %361 = vst [vmem:[%s2402_s26 + $0x90] sm:$0xff] %v360_v18  ;;  %363 = vst [vmem:[%s2402_s26 + $0x98] sm:$0xff] %v362_v19  ;;  %v366_v21 = vld [vmem:[%s2397_s28 + $0x138] sm:$0xff]  ;;  %v368_v22 = vld [vmem:[%s2397_s28 + $0x140] sm:$0xff] }
  0x31   : > { %365 = vst [vmem:[%s2402_s26 + $0xa0] sm:$0xff] %v364_v20  ;;  %v370_v23 = vld [vmem:[%s2397_s28 + $0x148] sm:$0xff]  ;;  %367 = vst [vmem:[%s2402_s26 + $0xa8] sm:$0xff] %v366_v21  ;;  %v372_v24 = vld [vmem:[%s2397_s28 + $0x150] sm:$0xff] }
  0x32   : > { %369 = vst [vmem:[%s2402_s26 + $0xb0] sm:$0xff] %v368_v22  ;;  %371 = vst [vmem:[%s2402_s26 + $0xb8] sm:$0xff] %v370_v23  ;;  %v374_v25 = vld [vmem:[%s2397_s28 + $0x158] sm:$0xff]  ;;  %v376_v26 = vld [vmem:[%s2397_s28 + $0x160] sm:$0xff] }
  0x33   : > { %373 = vst [vmem:[%s2402_s26 + $0xc0] sm:$0xff] %v372_v24  ;;  %375 = vst [vmem:[%s2402_s26 + $0xc8] sm:$0xff] %v374_v25  ;;  %v378_v27 = vld [vmem:[%s2397_s28 + $0x168] sm:$0xff]  ;;  %v380_v28 = vld [vmem:[%s2397_s28 + $0x170] sm:$0xff] }
  0x34   : > { %377 = vst [vmem:[%s2402_s26 + $0xd0] sm:$0xff] %v376_v26  ;;  %v382_v29 = vld [vmem:[%s2397_s28 + $0x178] sm:$0xff]  ;;  %379 = vst [vmem:[%s2402_s26 + $0xd8] sm:$0xff] %v378_v27  ;;  %v384_v30 = vld [vmem:[%s2397_s28 + $0x180] sm:$0xff] }
  0x35   : > { %381 = vst [vmem:[%s2402_s26 + $0xe0] sm:$0xff] %v380_v28  ;;  %383 = vst [vmem:[%s2402_s26 + $0xe8] sm:$0xff] %v382_v29  ;;  %v386_v31 = vld [vmem:[%s2397_s28 + $0x188] sm:$0xff]  ;;  %v388_v32 = vld [vmem:[%s2397_s28 + $0x190] sm:$0xff] }
  0x36   : > { %385 = vst [vmem:[%s2402_s26 + $0xf0] sm:$0xff] %v384_v30  ;;  %387 = vst [vmem:[%s2402_s26 + $0xf8] sm:$0xff] %v386_v31  ;;  %v390_v33 = vld [vmem:[%s2397_s28 + $0x198] sm:$0xff]  ;;  %v392_v34 = vld [vmem:[%s2397_s28 + $0x1a0] sm:$0xff] }
  0x37   : > { %389 = vst [vmem:[%s2402_s26 + $0x100] sm:$0xff] %v388_v32  ;;  %v394_v35 = vld [vmem:[%s2397_s28 + $0x1a8] sm:$0xff]  ;;  %391 = vst [vmem:[%s2402_s26 + $0x108] sm:$0xff] %v390_v33  ;;  %v396_v36 = vld [vmem:[%s2397_s28 + $0x240] sm:$0xff] }
  0x38   : > { %393 = vst [vmem:[%s2402_s26 + $0x110] sm:$0xff] %v392_v34  ;;  %395 = vst [vmem:[%s2402_s26 + $0x118] sm:$0xff] %v394_v35  ;;  %v398_v37 = vld [vmem:[%s2397_s28 + $0x248] sm:$0xff]  ;;  %v400_v38 = vld [vmem:[%s2397_s28 + $0x250] sm:$0xff] }
  0x39   : > { %397 = vst [vmem:[%s2402_s26 + $0x120] sm:$0xff] %v396_v36  ;;  %399 = vst [vmem:[%s2402_s26 + $0x128] sm:$0xff] %v398_v37  ;;  %v402_v39 = vld [vmem:[%s2397_s28 + $0x258] sm:$0xff]  ;;  %v404_v40 = vld [vmem:[%s2397_s28 + $0x260] sm:$0xff] }
  0x3a   : > { %401 = vst [vmem:[%s2402_s26 + $0x130] sm:$0xff] %v400_v38  ;;  %v406_v41 = vld [vmem:[%s2397_s28 + $0x268] sm:$0xff]  ;;  %403 = vst [vmem:[%s2402_s26 + $0x138] sm:$0xff] %v402_v39  ;;  %v408_v42 = vld [vmem:[%s2397_s28 + $0x270] sm:$0xff] }
  0x3b   : > { %405 = vst [vmem:[%s2402_s26 + $0x140] sm:$0xff] %v404_v40  ;;  %407 = vst [vmem:[%s2402_s26 + $0x148] sm:$0xff] %v406_v41  ;;  %v410_v43 = vld [vmem:[%s2397_s28 + $0x278] sm:$0xff]  ;;  %v412_v44 = vld [vmem:[%s2397_s28 + $0x280] sm:$0xff] }
  0x3c   : > { %409 = vst [vmem:[%s2402_s26 + $0x150] sm:$0xff] %v408_v42  ;;  %411 = vst [vmem:[%s2402_s26 + $0x158] sm:$0xff] %v410_v43  ;;  %v414_v45 = vld [vmem:[%s2397_s28 + $0x288] sm:$0xff]  ;;  %v416_v46 = vld [vmem:[%s2397_s28 + $0x290] sm:$0xff] }
  0x3d   : > { %413 = vst [vmem:[%s2402_s26 + $0x160] sm:$0xff] %v412_v44  ;;  %v418_v47 = vld [vmem:[%s2397_s28 + $0x298] sm:$0xff]  ;;  %415 = vst [vmem:[%s2402_s26 + $0x168] sm:$0xff] %v414_v45  ;;  %v420_v48 = vld [vmem:[%s2397_s28 + $0x2a0] sm:$0xff] }
  0x3e   : > { %417 = vst [vmem:[%s2402_s26 + $0x170] sm:$0xff] %v416_v46  ;;  %419 = vst [vmem:[%s2402_s26 + $0x178] sm:$0xff] %v418_v47  ;;  %v422_v49 = vld [vmem:[%s2397_s28 + $0x2a8] sm:$0xff]  ;;  %v424_v50 = vld [vmem:[%s2397_s28 + $0x2b0] sm:$0xff] }
  0x3f   : > { %421 = vst [vmem:[%s2402_s26 + $0x180] sm:$0xff] %v420_v48  ;;  %423 = vst [vmem:[%s2402_s26 + $0x188] sm:$0xff] %v422_v49  ;;  %v426_v51 = vld [vmem:[%s2397_s28 + $0x2b8] sm:$0xff]  ;;  %v428_v52 = vld [vmem:[%s2397_s28 + $0x2c0] sm:$0xff] }
  0x40   : > { %425 = vst [vmem:[%s2402_s26 + $0x190] sm:$0xff] %v424_v50  ;;  %v430_v53 = vld [vmem:[%s2397_s28 + $0x2c8] sm:$0xff]  ;;  %427 = vst [vmem:[%s2402_s26 + $0x198] sm:$0xff] %v426_v51  ;;  %v432_v54 = vld [vmem:[%s2397_s28 + $0x360] sm:$0xff] }
  0x41   : > { %429 = vst [vmem:[%s2402_s26 + $0x1a0] sm:$0xff] %v428_v52  ;;  %431 = vst [vmem:[%s2402_s26 + $0x1a8] sm:$0xff] %v430_v53  ;;  %v434_v55 = vld [vmem:[%s2397_s28 + $0x368] sm:$0xff]  ;;  %v436_v56 = vld [vmem:[%s2397_s28 + $0x370] sm:$0xff] }
  0x42   : > { %433 = vst [vmem:[%s2402_s26 + $0x1b0] sm:$0xff] %v432_v54  ;;  %435 = vst [vmem:[%s2402_s26 + $0x1b8] sm:$0xff] %v434_v55  ;;  %v438_v57 = vld [vmem:[%s2397_s28 + $0x378] sm:$0xff]  ;;  %v440_v58 = vld [vmem:[%s2397_s28 + $0x380] sm:$0xff] }
  0x43   : > { %437 = vst [vmem:[%s2402_s26 + $0x1c0] sm:$0xff] %v436_v56  ;;  %v442_v59 = vld [vmem:[%s2397_s28 + $0x388] sm:$0xff]  ;;  %439 = vst [vmem:[%s2402_s26 + $0x1c8] sm:$0xff] %v438_v57  ;;  %v444_v60 = vld [vmem:[%s2397_s28 + $0x390] sm:$0xff] }
  0x44   : > { %441 = vst [vmem:[%s2402_s26 + $0x1d0] sm:$0xff] %v440_v58  ;;  %443 = vst [vmem:[%s2402_s26 + $0x1d8] sm:$0xff] %v442_v59  ;;  %v446_v61 = vld [vmem:[%s2397_s28 + $0x398] sm:$0xff]  ;;  %v448_v62 = vld [vmem:[%s2397_s28 + $0x3a0] sm:$0xff] }
  0x45   : > { %445 = vst [vmem:[%s2402_s26 + $0x1e0] sm:$0xff] %v444_v60  ;;  %447 = vst [vmem:[%s2402_s26 + $0x1e8] sm:$0xff] %v446_v61  ;;  %v450_v63 = vld [vmem:[%s2397_s28 + $0x3a8] sm:$0xff]  ;;  %v452_v0 = vld [vmem:[%s2397_s28 + $0x3b0] sm:$0xff] }
  0x46   : > { %449 = vst [vmem:[%s2402_s26 + $0x1f0] sm:$0xff] %v448_v62  ;;  %v454_v1 = vld [vmem:[%s2397_s28 + $0x3b8] sm:$0xff]  ;;  %451 = vst [vmem:[%s2402_s26 + $0x1f8] sm:$0xff] %v450_v63  ;;  %v456_v2 = vld [vmem:[%s2397_s28 + $0x3c0] sm:$0xff] }
  0x47   : > { %453 = vst [vmem:[%s2402_s26 + $0x200] sm:$0xff] %v452_v0  ;;  %455 = vst [vmem:[%s2402_s26 + $0x208] sm:$0xff] %v454_v1  ;;  %v458_v3 = vld [vmem:[%s2397_s28 + $0x3c8] sm:$0xff]  ;;  %v460_v4 = vld [vmem:[%s2397_s28 + $0x3d0] sm:$0xff] }
  0x48   : > { %457 = vst [vmem:[%s2402_s26 + $0x210] sm:$0xff] %v456_v2  ;;  %459 = vst [vmem:[%s2402_s26 + $0x218] sm:$0xff] %v458_v3  ;;  %v462_v5 = vld [vmem:[%s2397_s28 + $0x3d8] sm:$0xff]  ;;  %v464_v6 = vld [vmem:[%s2397_s28 + $0x3e0] sm:$0xff] }
  0x49   : > { %461 = vst [vmem:[%s2402_s26 + $0x220] sm:$0xff] %v460_v4  ;;  %v466_v7 = vld [vmem:[%s2397_s28 + $0x3e8] sm:$0xff]  ;;  %463 = vst [vmem:[%s2402_s26 + $0x228] sm:$0xff] %v462_v5 }
  0x4a   : > { %465 = vst [vmem:[%s2402_s26 + $0x230] sm:$0xff] %v464_v6  ;;  %467 = vst [vmem:[%s2402_s26 + $0x238] sm:$0xff] %v466_v7 }
  0x4b PF: > { %p1649_p0 = scmp.ge.s32.totalorder %s2274_s21, 1  ;;  %p472_p1 = scmp.lt.s32.totalorder %s2274_s21, 5 }
  0x4d   : > { %p473_p2 = pnand %p1649_p0, %p472_p1 }
  0x4e   : > { %v1658_v8 = vld [vmem:[%s2814_s1 + $0x20] sm:$0xff] (!%p473_p2)  ;;  %v1659_v9 = vld [vmem:[%s2814_s1 + $0x28] sm:$0xff] (!%p473_p2)  ;;  %s479_s11 = sand.u32 (!%p473_p2), 1, %s2250_s15   ;;  %v1660_v13 = vld [vmem:[%s2814_s1 + $0x30] sm:$0xff] (!%p473_p2)  ;;  %s1763_s5 = sshll.u32 (!%p473_p2), %s2258_s17, 6  ;;  %vm525_vm0 = vcmask (!%p473_p2), 261120  }
  0x4f   : > { %476 = sbr.rel (%p473_p2) target bundleno = 357 (0x165), region = 66  ;;  %v1696_v10 = vld [vmem:[%s2814_s1 + $0x80] sm:$0xff] (!%p473_p2)  ;;  %v1964_v11 = vpack.c.bf16 (!%p473_p2), %v1659_v9, %v1658_v8  ;;  %v1697_v12 = vld [vmem:[%s2814_s1 + $0x88] sm:$0xff] (!%p473_p2)  ;;  %v1661_v14 = vld [vmem:[%s2814_s1 + $0x38] sm:$0xff] (!%p473_p2)  ;;  %s1759_s15 = sshll.u32 (!%p473_p2), %s2262_s18, 3  ;;  %vm1522_vm1 = vcmask (!%p473_p2), 523264  }
  0x50   : > { %s2074_s4 = smul.u32 (!%p473_p2), 576, %s479_s11  ;;  %v1996_v15 = vpack.c.bf16 (!%p473_p2), %v1697_v12, %v1696_v10  ;;  %v1968_v16 = vpack.c.bf16 (!%p473_p2), %v1661_v14, %v1660_v13  ;;  %v1698_v17 = vld [vmem:[%s2814_s1 + $0x90] sm:$0xff] (!%p473_p2)  ;;  %v1699_v18 = vld [vmem:[%s2814_s1 + $0x98] sm:$0xff] (!%p473_p2)  ;;  %v510_v19 = vld [vmem:[%s2814_s1] sm:$0xff] (!%p473_p2) }
  0x51   : > { %1965 = vmatprep.subr.bf16.mxu1 (!%p473_p2), %v1964_v11  ;;  %v2000_v20 = vpack.c.bf16 (!%p473_p2), %v1699_v18, %v1698_v17  ;;  %v511_v21 = vld [vmem:[%s2814_s1 + $0x8] sm:$0xff] (!%p473_p2)  ;;  %v1708_v22 = vld [vmem:[%s2814_s1 + $0xa0] sm:$0xff] (!%p473_p2)  ;;  %v512_v28 = vld [vmem:[%s2814_s1 + $0x10] sm:$0xff] (!%p473_p2) }
  0x52   : > { %v1709_v23 = vld [vmem:[%s2814_s1 + $0xa8] sm:$0xff] (!%p473_p2)  ;;  %1997 = vmatprep.subr.bf16.mxu0 (!%p473_p2), %v1996_v15  ;;  %1967 = vmatpush3.bf16.msra.mxu1 (!%p473_p2), %v1964_v11  ;;  %s481_s0 = scalar_lea.vmem (!%p473_p2), [#allocation2], %s2074_s4  ;;  %v1972_v26 = vpack.c.bf16 (!%p473_p2), %v511_v21, %v510_v19  ;;  %v513_v29 = vld [vmem:[%s2814_s1 + $0x18] sm:$0xff] (!%p473_p2)  ;;  %v1710_v31 = vld [vmem:[%s2814_s1 + $0xb0] sm:$0xff] (!%p473_p2)  ;;  %s499_s4 = sand.u32 (!%p473_p2), 1, %s2242_s13  }
  0x53   : > { %s2585_s10 = scalar_lea.vmem (!%p473_p2), %s481_s0, %s1763_s5 [#allocation2]  ;;  %1999 = vmatpush3.bf16.msra.mxu0 (!%p473_p2), %v1996_v15  ;;  %1969 = vmatprep.subr.bf16.mxu1 (!%p473_p2), %v1968_v16  ;;  %v2004_v27 = vpack.c.bf16 (!%p473_p2), %v1709_v23, %v1708_v22  ;;  %v1711_v32 = vld [vmem:[%s2814_s1 + $0xb8] sm:$0xff] (!%p473_p2)  ;;  %v1976_v35 = vpack.c.bf16 (!%p473_p2), %v513_v29, %v512_v28  ;;  %v1670_v38 = vld [vmem:[%s2814_s1 + $0x40] sm:$0xff] (!%p473_p2)  ;;  %v1671_v39 = vld [vmem:[%s2814_s1 + $0x48] sm:$0xff] (!%p473_p2)  ;;  %s1650_s5 = sshll.u32 (!%p473_p2), %s499_s4, 5 }
  0x54   : > { %v1654_v24 = vld [vmem:[%s2585_s10 + $0x90] sm:$0xff] (!%p473_p2)  ;;  %2001 = vmatprep.subr.bf16.mxu0 (!%p473_p2), %v2000_v20  ;;  %v2598_v30 = vld [vmem:[%s2585_s10 + $0xa0] sm:$0xff] (!%p473_p2)  ;;  %v2008_v37 = vpack.c.bf16 (!%p473_p2), %v1711_v32, %v1710_v31  ;;  %v1723_v42 = vld [vmem:[%s2814_s1 + $0xc8] sm:$0xff] (!%p473_p2)  ;;  %v1980_v45 = vpack.c.bf16 (!%p473_p2), %v1671_v39, %v1670_v38  ;;  %s2755_s9 = scalar_lea.sflag (!%p473_p2), [#allocation4], %s499_s4 }
  0x55   : > { %v1692_v25 = vld [vmem:[%s2585_s10 + $0x1b0] sm:$0xff] (!%p473_p2)  ;;  %1846 = vmatprep.mubr.msk.f32.mxu1 (!%p473_p2), %vm525_vm0, %v1654_v24  ;;  %v1693_v33 = vld [vmem:[%s2585_s10 + $0x1c0] sm:$0xff] (!%p473_p2)  ;;  %v1673_v49 = vld [vmem:[%s2814_s1 + $0x58] sm:$0xff] (!%p473_p2) }
  0x56   : > { %1902 = vmatprep.mubr.msk.f32.mxu0 %vm525_vm0, %v1692_v25  ;;  %1971 = vmatpush3.bf16.msra.mxu1 %v1968_v16  ;;  %v2608_v34 = vld [vmem:[%s2585_s10 + $0xb0] sm:$0xff]  ;;  %v2621_v40 = vld [vmem:[%s2585_s10 + $0xc0] sm:$0xff]  ;;  %v1725_v52 = vld [vmem:[%s2814_s1 + $0xd8] sm:$0xff] }
  0x57   : > { %2003 = vmatpush3.bf16.msra.mxu0 %v2000_v20  ;;  %1973 = vmatprep.subr.bf16.mxu1 %v1972_v26  ;;  %v1694_v36 = vld [vmem:[%s2585_s10 + $0x1d0] sm:$0xff]  ;;  %v1722_v41 = vld [vmem:[%s2814_s1 + $0xc0] sm:$0xff]  ;;  %v1684_v59 = vld [vmem:[%s2814_s1 + $0x68] sm:$0xff] }
  0x58   : > { %2005 = vmatprep.subr.bf16.mxu0 %v2004_v27  ;;  %v1695_v43 = vld [vmem:[%s2585_s10 + $0x1e0] sm:$0xff]  ;;  %v2012_v47 = vpack.c.bf16 %v1723_v42, %v1722_v41  ;;  %v1672_v48 = vld [vmem:[%s2814_s1 + $0x50] sm:$0xff]  ;;  %v1737_v62 = vld [vmem:[%s2814_s1 + $0xe8] sm:$0xff] }
  0x59   : > { %1847 = vmatmul.mubr.msk.f32.vlgmr.msra.gmra.mrb[0].mxu1 %vm525_vm0, %v2598_v30  ;;  %v506_v44 = vld [vmem:[%s2585_s10] sm:$0xff]  ;;  %v507_v50 = vld [vmem:[%s2585_s10 + $0x10] sm:$0xff]  ;;  %v1984_v55 = vpack.c.bf16 %v1673_v49, %v1672_v48  ;;  %v1686_v4 = vld [vmem:[%s2814_s1 + $0x78] sm:$0xff] }
  0x5a   : > { %1903 = vmatmul.mubr.msk.f32.vlgmr.msra.gmra.mrb[0].mxu0 %vm525_vm0, %v1693_v33  ;;  %1975 = vmatpush3.bf16.msra.mxu1 %v1972_v26  ;;  %v1704_v46 = vld [vmem:[%s2585_s10 + $0x121] sm:$0xff]  ;;  %v1724_v51 = vld [vmem:[%s2814_s1 + $0xd0] sm:$0xff]  ;;  %v1739_v7 = vld [vmem:[%s2814_s1 + $0xf8] sm:$0xff] }
  0x5b   : > { %2007 = vmatpush3.bf16.msra.mxu0 %v2004_v27  ;;  %1849 = vmatprep.mubr.msk.f32.mxu1 %vm525_vm0, %v2608_v34  ;;  %v1705_v53 = vld [vmem:[%s2585_s10 + $0x131] sm:$0xff]  ;;  %v508_v54 = vld [vmem:[%s2585_s10 + $0x20] sm:$0xff]  ;;  %v2016_v57 = vpack.c.bf16 %v1725_v52, %v1724_v51  ;;  %v1749_v12 = vld [vmem:[%s2814_s1 + $0x108] sm:$0xff] }
  0x5c   : > { %1905 = vmatprep.mubr.msk.f32.mxu0 %vm525_vm0, %v1694_v36  ;;  %1977 = vmatprep.subr.bf16.mxu1 %v1976_v35  ;;  %v1706_v56 = vld [vmem:[%s2585_s10 + $0x141] sm:$0xff]  ;;  %v509_v60 = vld [vmem:[%s2585_s10 + $0x30] sm:$0xff]  ;;  %v1751_v18 = vld [vmem:[%s2814_s1 + $0x118] sm:$0xff] }
  0x5d   : > { %1850 = vmatmul.mubr.msk.f32.gmra.mrb[2].mxu1 %vm525_vm0, %v2621_v40  ;;  %2009 = vmatprep.subr.bf16.mxu0 %v2008_v37  ;;  %v1683_v58 = vld [vmem:[%s2814_s1 + $0x60] sm:$0xff]  ;;  %v1707_v63 = vld [vmem:[%s2585_s10 + $0x151] sm:$0xff] }
  0x5e   : > { %1906 = vmatmul.mubr.msk.f32.gmra.mrb[2].mxu0 %vm525_vm0, %v1695_v43  ;;  %1979 = vmatpush3.bf16.msra.mxu1 %v1976_v35  ;;  %v1736_v61 = vld [vmem:[%s2814_s1 + $0xe0] sm:$0xff]  ;;  %v1988_v1 = vpack.c.bf16 %v1684_v59, %v1683_v58  ;;  %v1685_v3 = vld [vmem:[%s2814_s1 + $0x70] sm:$0xff] }
  0x5f   : > { %2011 = vmatpush3.bf16.msra.mxu0 %v2008_v37  ;;  %1860 = vmatprep.mubr.msk.f32.mxu1 %vm525_vm0, %v506_v44  ;;  %v720_v0 = vld [vmem:[%s2585_s10 + $0x1] sm:$0xff]  ;;  %v2020_v2 = vpack.c.bf16 %v1737_v62, %v1736_v61  ;;  %v721_v5 = vld [vmem:[%s2585_s10 + $0x11] sm:$0xff]  ;;  %v1992_v9 = vpack.c.bf16 %v1686_v4, %v1685_v3  ;;  %v1756_v33 = vld [vmem:[%s2815_s2] ss:$0 sm:$0xff] }
  0x60   : > { %1916 = vmatprep.mubr.msk.f32.mxu0 %vm525_vm0, %v1704_v46  ;;  %1981 = vmatprep.subr.bf16.mxu1 %v1980_v45  ;;  %v1738_v6 = vld [vmem:[%s2814_s1 + $0xf0] sm:$0xff]  ;;  %v722_v8 = vld [vmem:[%s2585_s10 + $0x21] sm:$0xff] }
  0x61   : > { %1861 = vmatmul.mubr.msk.f32.vlgmr.msra.gmra.mrb[0].mxu1 %vm525_vm0, %v507_v50  ;;  %2013 = vmatprep.subr.bf16.mxu0 %v2012_v47  ;;  %v2024_v10 = vpack.c.bf16 %v1739_v7, %v1738_v6  ;;  %v1748_v11 = vld [vmem:[%s2814_s1 + $0x100] sm:$0xff]  ;;  %v723_v13 = vld [vmem:[%s2585_s10 + $0x31] sm:$0xff] }
  0x62   : > { %1917 = vmatmul.mubr.msk.f32.vlgmr.msra.gmra.mrb[0].mxu0 %vm525_vm0, %v1705_v53  ;;  %1983 = vmatpush3.bf16.msra.mxu1 %v1980_v45  ;;  %v1721_v14 = vld [vmem:[%s2585_s10 + $0x40] sm:$0xff]  ;;  %v2028_v16 = vpack.c.bf16 %v1749_v12, %v1748_v11  ;;  %v1750_v17 = vld [vmem:[%s2814_s1 + $0x110] sm:$0xff] }
  0x63   : > { %2015 = vmatpush3.bf16.msra.mxu0 %v2012_v47  ;;  %1863 = vmatprep.mubr.msk.f32.mxu1 %vm525_vm0, %v508_v54  ;;  %v1679_v15 = vld [vmem:[%s2585_s10 + $0x120] sm:$0xff]  ;;  %v1680_v19 = vld [vmem:[%s2585_s10 + $0x130] sm:$0xff]  ;;  %v2032_v21 = vpack.c.bf16 %v1751_v18, %v1750_v17 }
  0x64   : > { %1919 = vmatprep.mubr.msk.f32.mxu0 %vm525_vm0, %v1706_v56  ;;  %1985 = vmatprep.subr.bf16.mxu1 %v1984_v55  ;;  %v1681_v20 = vld [vmem:[%s2585_s10 + $0x140] sm:$0xff]  ;;  %v1682_v22 = vld [vmem:[%s2585_s10 + $0x150] sm:$0xff] }
  0x65   : > { %1864 = vmatmul.mubr.msk.f32.gmra.mrb[2].mxu1 %vm525_vm0, %v509_v60  ;;  %2017 = vmatprep.subr.bf16.mxu0 %v2016_v57  ;;  %v1735_v23 = vld [vmem:[%s2585_s10 + $0xd0] sm:$0xff]  ;;  %v1747_v24 = vld [vmem:[%s2585_s10 + $0x41] sm:$0xff]  ;;  %s1758_s10 = sshll.u32 %s2258_s17, 2  ;;  %s501_s17 = scalar_lea.vmem [#allocation3], %s1650_s5 }
  0x66   : > { %1920 = vmatmul.mubr.msk.f32.gmra.mrb[2].mxu0 %vm525_vm0, %v1707_v63  ;;  %1987 = vmatpush3.bf16.msra.mxu1 %v1984_v55  ;;  %s1540_s28 = sadd.s32 %s1759_s15, %s1758_s10  ;;  %s1543_s18 = sshll.u32 %s501_s17, 4  ;;  %s2747_s18 = int_to_ptr.vmem [resolvable:$true] %s1543_s18 }
  0x67   : > { %2019 = vmatpush3.bf16.msra.mxu0 %v2016_v57  ;;  %1874 = vmatprep.mubr.msk.f32.mxu1 %vm525_vm0, %v720_v0  ;;  %s1760_s11 = sshll.u32 %s1540_s28, 7  ;;  %s2164_s0 = scalar_lea.vmem %s2747_s18, 512 }
  0x68   : > { %1930 = vmatprep.mubr.msk.f32.mxu0 %vm525_vm0, %v507_v50  ;;  %1989 = vmatprep.subr.bf16.mxu1 %v1988_v1  ;;  %s2745_s29 = scalar_lea.hbm %s2816_s3, %s1760_s11  ;;  %p2165_p3 = scmp.ne.s32.totalorder %s2747_s18, %s2164_s0 }
  0x69   : > { %1875 = vmatmul.mubr.msk.f32.vlgmr.msra.gmra.mrb[0].mxu1 %vm525_vm0, %v721_v5  ;;  %2021 = vmatprep.subr.bf16.mxu0 %v2020_v2  ;;  %s2276_s5 = smov [#allocation3]  }
  0x6a   : > { %1931 = vmatmul.mubr.msk.f32.vlgmr.msra.gmra.mrb[0].mxu0 %vm525_vm0, %v508_v54  ;;  %1991 = vmatpush3.bf16.msra.mxu1 %v1988_v1  ;;  %p2166_p4 = pnand %p2165_p3, %p2371_p7  ;;  %s2168_s10 = sshll.u32 %s2276_s5, 4  ;;  %s2169_s10 = int_to_ptr.vmem [resolvable:$false] %s2168_s10 }
  0x6b   : > { %2023 = vmatpush3.bf16.msra.mxu0 %v2020_v2  ;;  %1877 = vmatprep.mubr.msk.f32.mxu1 %vm525_vm0, %v722_v8  ;;  %s2170_s15 = scalar_lea.vmem %s2169_s10, 1024  ;;  %p2171_p6 = scmp.lt.s32.totalorder %s2747_s18, %s2169_s10 }
  0x6c   : > { %1933 = vmatprep.mubr.msk.f32.mxu0 %vm525_vm0, %v509_v60  ;;  %1993 = vmatprep.subr.bf16.mxu1 %v1992_v9  ;;  %p2167_p5 = pneg %p2166_p4  ;;  %p2172_p8 = scmp.lt.s32.totalorder %s2170_s15, %s2164_s0 }
  0x6d   : > { %1878 = vmatmul.mubr.msk.f32.gmra.mrb[2].mxu1 %vm525_vm0, %v723_v13  ;;  %2025 = vmatprep.subr.bf16.mxu0 %v2024_v10 }
  0x6e   : > { %1934 = vmatmul.mubr.msk.f32.gmra.mrb[2].mxu0 %vm525_vm0, %v1721_v14  ;;  %1995 = vmatpush3.bf16.msra.mxu1 %v1992_v9  ;;  %p2173_p9 = por %p2172_p8, %p2171_p6 }
  0x6f   : > { %2027 = vmatpush3.bf16.msra.mxu0 %v2024_v10  ;;  %1888 = vmatprep.mubr.msk.f32.mxu1 %vm525_vm0, %v1679_v15 }
  0x70   : > { %1944 = vmatprep.mubr.msk.f32.mxu0 %vm525_vm0, %v2598_v30  ;;  %2029 = vmatprep.subr.bf16.mxu0 %v2028_v16  ;;  %p2174_p10 = pnand %p2173_p9, %p2167_p5 }
  0x71   : > { %1889 = vmatmul.mubr.msk.f32.vlgmr.msra.gmra.mrb[0].mxu1 %vm525_vm0, %v1680_v19  ;;  %2036 = vmatprep.subr.bf16.mxu1 %v2028_v16 }
  0x72   : > { %1945 = vmatmul.mubr.msk.f32.vlgmr.msra.gmra.mrb[0].mxu0 %vm525_vm0, %v2608_v34  ;;  %2038 = vmatpush3.bf16.msra.mxu1 %v2028_v16 }
  0x73   : > { %2031 = vmatpush3.bf16.msra.mxu0 %v2028_v16  ;;  %1891 = vmatprep.mubr.msk.f32.mxu1 %vm525_vm0, %v1681_v20 }
  0x74   : > { %1947 = vmatprep.mubr.msk.f32.mxu0 %vm525_vm0, %v2621_v40  ;;  %2033 = vmatprep.subr.bf16.mxu0 %v2032_v21 }
  0x75   : > { %1892 = vmatmul.mubr.msk.f32.gmra.mrb[2].mxu1 %vm525_vm0, %v1682_v22  ;;  %2037 = vmatprep.subr.bf16.mxu1 %v2032_v21 }
  0x76   : > { %1948 = vmatmul.mubr.msk.f32.gmra.mrb[2].mxu0 %vm525_vm0, %v1735_v23  ;;  %2039 = vmatpush3.bf16.msra.mxu1 %v2032_v21 }
  0x77   : > { %2035 = vmatpush3.bf16.msra.mxu0 %v2032_v21  ;;  %1958 = vmatprep.mubr.msk.f32.mxu0 %vm525_vm0, %v721_v5 }
  0x78   : > { %1961 = vmatprep.mubr.msk.f32.mxu1 %vm525_vm0, %v723_v13 }
  0x79   : > { %1962 = vmatmul.mubr.msk.f32.vlgmr.msra.gmra.mrb[4].mxu1 %vm525_vm0, %v1747_v24 }
  0x7a   : > { %1959 = vmatmul.mubr.msk.f32.vlgmr.msra.gmra.mrb[0].mxu0 %vm525_vm0, %v722_v8 }
 0x144   : > { %v1890_v25 = vpop.f32.mrb[0].mxu1 }
 0x145   : > { %v919_v26 = vpop.f32.mrb[1].mxu1 }
 0x148   : > { %v1893_v27 = vpop.f32.mrb[2].mxu1 }
 0x149   : > { %v1949_v28 = vpop.f32.mrb[2].mxu0  ;;  %v929_v29 = vpop.f32.mrb[3].mxu1 }
 0x14a   : > { %v2042_v30 = vadd.f32 %v1949_v28, %v1893_v27  ;;  %v1376_v31 = vpop.f32.mrb[3].mxu0 }
 0x14b   : > { %v2044_v32 = vadd.f32 %v1376_v31, %v929_v29 }
 0x14c   : > { %v1963_v34 = vpop.f32.mrb[4].mxu1 }
 0x14d   : > { %v1960_v35 = vpop.f32.mrb[0].mxu0  ;;  %v2043_v36 = vadd.f32 %v2042_v30, %v1963_v34  ;;  %v1486_v37 = vpop.f32.mrb[5].mxu1 }
 0x14e   : > { %v2040_v38 = vadd.f32 %v1960_v35, %v1890_v25  ;;  %v1476_v39 = vpop.f32.mrb[1].mxu0  ;;  %v2045_v40 = vadd.f32 %v2044_v32, %v1486_v37 }
 0x14f   : > { %v1509_v41 = vadd.f32 %v2043_v36, %v1756_v33  ;;  %v2041_v42 = vadd.f32 %v1476_v39, %v919_v26 }
 0x150   : > { %v1507_v43 = vadd.f32 %v2040_v38, %v1756_v33  ;;  %v1508_v44 = vadd.f32 %v2045_v40, %v1756_v33 }
 0x151   : > { %vm1513_vm2 = vcmp.ge.f32.partialorder %v1509_v41, 0.0  ;;  %v1517_v45 = vmul.f32 0.01, %v1509_v41  ;;  %v1506_v46 = vadd.f32 %v2041_v42, %v1756_v33 }
 0x152   : > { %vm1511_vm3 = vcmp.ge.f32.partialorder %v1507_v43, 0.0  ;;  %v1515_v47 = vmul.f32 0.01, %v1507_v43  ;;  %vm1512_vm4 = vcmp.ge.f32.partialorder %v1508_v44, 0.0  ;;  %v1516_v48 = vmul.f32 0.01, %v1508_v44 }
 0x153   : > { %v1521_v49 = vsel %vm1513_vm2, %v1509_v41, %v1517_v45  ;;  %vm1510_vm5 = vcmp.ge.f32.partialorder %v1506_v46, 0.0  ;;  %v1514_v50 = vmul.f32 0.01, %v1506_v46 }
 0x154   : > { %v1519_v51 = vsel %vm1511_vm3, %v1507_v43, %v1515_v47  ;;  %1526 = vst.msk [vmem:[%s501_s17 + $0x18] sm:$0xff] %vm1522_vm1, %v1521_v49  ;;  %v1520_v52 = vsel %vm1512_vm4, %v1508_v44, %v1516_v48 }
 0x155   : > { %1524 = vst.msk [vmem:[%s501_s17 + $0x8] sm:$0xff] %vm1522_vm1, %v1519_v51  ;;  %v1518_v53 = vsel %vm1510_vm5, %v1506_v46, %v1514_v50  ;;  %1525 = vst.msk [vmem:[%s501_s17 + $0x10] sm:$0xff] %vm1522_vm1, %v1520_v52 }
 0x156   : > { %1523 = vst.msk [vmem:[%s501_s17] sm:$0xff] %vm1522_vm1, %v1518_v53 }
 0x157   : > { %2177 = shalt.err (!%p2174_p10)
}
 0x158   : > { %s2178_s4 = scalar_lea.hbm %s2745_s29, 512  ;;  %s2182_s28 = scalar_lea.hbm %s2816_s3, 2048 }
 0x159   : > { %p2179_p11 = scmp.ne.s32.totalorder %s2745_s29, %s2178_s4  ;;  %p2183_p1 = scmp.lt.u32.totalorder %s2745_s29, %s2816_s3 }
 0x15a   : > { %p2184_p2 = scmp.lt.u32.totalorder %s2182_s28, %s2178_s4  ;;  %p2186_p4 = scmp.lt.u32.totalorder %s2178_s4, %s2745_s29 }
 0x15b   : > { %p2180_p13 = pnand %p2179_p11, %p2371_p7 }
 0x15c   : > { %p2185_p3 = por %p2184_p2, %p2183_p1 }
 0x15d   : > { %p2181_p0 = pneg %p2180_p13 }
 0x15e   : > { %p2187_p5 = por %p2186_p4, %p2185_p3 }
 0x160   : > { %p2188_p6 = pnand %p2187_p5, %p2181_p0 }
 0x162   : > { %2191 = shalt.err (!%p2188_p6)
}
 0x163   : > { %s2277_s26 = smov 128   ;;  %s2278_s27 = smov 8  }
 0x164   : > { %2075 = dma.vmem_to_hbm [thread:$0]  (%p2371_p7), %s2747_s18, 512, %s2745_s29, %s2755_s9, %s2277_s26, %s2277_s26, %s2278_s27  }
 0x165 PF: > { %p2081_p8 = scmp.ge.s32.totalorder %s2274_s21, 2  ;;  %s1558_s0 = sand.u32 1, %s2238_s12  }
 0x166   : > { %s1559_s5 = scalar_lea.sflag [#allocation4], %s1558_s0 }
 0x167   : > { %p2078_p9 = pnand %p2081_p8, %p2379_p12 }
 0x169   : > { %2233 = dma.done.wait (!%p2078_p9), %s1559_s5, 512  }
 0x16a   : > { %2235 = vsyncadd (!%p2078_p9), %s1559_s5, 4294966784  ;;  %s16_s21 = sadd.s32 1, %s2274_s21   ;;  %s2822_s12 = smov %s2242_s13 }
 0x16b   : > { %p13_p10 = scmp.ge.s32.totalorder %s16_s21, 6   ;;  %s2823_s13 = smov %s2246_s14 }
 0x16c   : > { %s2824_s14 = smov %s2387_s8  ;;  %s2825_s15 = smov %s2254_s16 }
 0x16d   : > { %s2826_s16 = smov %s2384_s7  ;;  %s2827_s17 = smov %s2266_s19 }
 0x16e   : > { %s2828_s18 = smov %s2270_s20  ;;  %s2829_s19 = smov %s2832_s24 }
 0x16f   : > { %s2830_s20 = smov %s2836_s25  ;;  %15 = sbr.rel (!%p13_p10) target bundleno = 8 (0x8), region = 124 }
 0x176   :  { %1564 = vsyncpa [#allocation4], 1 }
 0x177   :  { %1566 = vsyncpa [#allocation4 + $0x1], 1 }

</bundles_post_ra>
